<compile_context>
chip_gen: v6e
topology: v6e:2x2x1
jax: 0.10.0
libtpu: 0.0.40
codegen_flags: <defaults>
</compile_context>

<pallas_src>
import functools

import jax
import jax.numpy as jnp
from jax.experimental import pallas as pl
from jax.experimental.pallas import tpu as pltpu


def _round_up(x, m):
    return ((x + m - 1) // m) * m


# -----------------------------------------------------------------------------
# Pallas kernels: fused (1x1 conv head -> loss reduction)
#
# Per grid step (image i, spatial split p, tile s):
#   x_ref   : (C_in,  TM)        activations, spatial positions on lanes
#   wt_ref  : (C_out, C_in)      resident transposed head weight (same dtype as x)
#   b_ref   : (C_out, 1)  f32    resident head bias
#   t_ref   : seg -> (1, TM) i32 class ids;  lane -> (C_out, TM) targets
#   loss_ref: (8, 128)    f32    partial loss for (image, split), scalar bcast
#   acc_ref : seg -> (1, TM) f32; lane -> (C_out, TM) f32  partial-sum accum
#
# All pre-mask reductions are per-lane (axis=0 over channels), so garbage in
# the padded lanes of the tail tile never contaminates valid lanes; the tail
# lanes are zeroed (via select, not multiply) before accumulation.
# -----------------------------------------------------------------------------
def _seg_ce_kernel(x_ref, wt_ref, b_ref, t_ref, loss_ref, acc_ref, *,
                   hw, inv_m, tm, num_s, mask_tail):
    p = pl.program_id(1)
    s = pl.program_id(2)
    s_per = pl.num_programs(2)

    @pl.when(s == 0)
    def _():
        acc_ref[...] = jnp.zeros_like(acc_ref)

    # Native-dtype operands straight to the MXU; f32 accumulation. Bias in f32.
    logits = jnp.dot(wt_ref[...], x_ref[...],
                     preferred_element_type=jnp.float32) + b_ref[...]
    m = jnp.max(logits, axis=0, keepdims=True)                     # (1, TM)
    z = logits - m
    lse = jnp.log(jnp.sum(jnp.exp(z), axis=0, keepdims=True))      # (1, TM)
    cls = t_ref[...]                                               # (1, TM) i32
    ch = jax.lax.broadcasted_iota(jnp.int32, z.shape, 0)
    picked = jnp.sum(jnp.where(ch == cls, z, 0.0), axis=0, keepdims=True)
    ce = lse - picked                                              # -log p[target]

    if mask_tail:
        g = p * s_per + s                 # global spatial block index
        is_tail = g == num_s - 1

        @pl.when(is_tail)
        def _():
            lane = jax.lax.broadcasted_iota(jnp.int32, ce.shape, 1)
            acc_ref[...] += jnp.where(g * tm + lane < hw, ce, 0.0)

        @pl.when(g != num_s - 1)
        def _():
            acc_ref[...] += ce
    else:
        acc_ref[...] += ce                                          # VPU-only

    @pl.when(s == s_per - 1)
    def _():
        total = jnp.sum(acc_ref[...]) * inv_m                       # one XLU reduce
        loss_ref[...] = jnp.broadcast_to(total, loss_ref.shape).astype(jnp.float32)


def _lane_mse_kernel(x_ref, wt_ref, b_ref, t_ref, loss_ref, acc_ref, *,
                     hw, inv_m, tm, num_s, mask_tail):
    p = pl.program_id(1)
    s = pl.program_id(2)
    s_per = pl.num_programs(2)

    @pl.when(s == 0)
    def _():
        acc_ref[...] = jnp.zeros_like(acc_ref)

    preds = jnp.dot(wt_ref[...], x_ref[...],
                    preferred_element_type=jnp.float32) + b_ref[...]
    diff = preds - t_ref[...].astype(jnp.float32)
    sq = diff * diff                                                # (C_out, TM)

    if mask_tail:
        g = p * s_per + s
        is_tail = g == num_s - 1

        @pl.when(is_tail)
        def _():
            lane = jax.lax.broadcasted_iota(jnp.int32, sq.shape, 1)
            acc_ref[...] += jnp.where(g * tm + lane < hw, sq, 0.0)

        @pl.when(g != num_s - 1)
        def _():
            acc_ref[...] += sq
    else:
        acc_ref[...] += sq

    @pl.when(s == s_per - 1)
    def _():
        total = jnp.sum(acc_ref[...]) * inv_m
        loss_ref[...] = jnp.broadcast_to(total, loss_ref.shape).astype(jnp.float32)


def _fused_head_loss(mode, x_nchw, w_t, b_col, target, mean_denom, tm=1024):
    """Fused (1x1-conv head + loss) over NCHW inputs; no host transpose/cast."""
    n, c_in, h, w = x_nchw.shape
    c_out = w_t.shape[0]
    hw = h * w

    # TM sweep range 1024-2048; clamp to spatial extent and lane multiples.
    tm = max(128, min(_round_up(int(tm), 128), _round_up(hw, 128)))
    num_s = pl.cdiv(hw, tm)
    mask_tail = (hw % tm) != 0

    # NCHW -> (N, C, H*W): metadata-only reshape, no dtype cast (avoids an HBM
    # round trip).  bf16 producers flow straight to the MXU below.
    x3 = x_nchw.reshape(n, c_in, hw)
    wt = w_t.astype(x3.dtype)            # tiny resident weight, match x dtype
    b = b_col.astype(jnp.float32)

    if mode == "seg":
        t3 = target.reshape(n, 1, hw).astype(jnp.int32)   # class-index targets
        t_blockdims = (None, 1, tm)
        t_rows = 1
        acc_shape = (1, tm)
        kernel_fn = _seg_ce_kernel
    else:
        t3 = target.reshape(n, c_out, hw)                 # regression targets
        t_blockdims = (None, c_out, tm)
        t_rows = c_out
        acc_shape = (c_out, tm)
        kernel_fn = _lane_mse_kernel

    # v7x: with batch == 1 the only parallel axis would leave a TensorCore
    # idle, so split the spatial tiles across a second parallel axis (only
    # when it divides evenly); no-op on single-TC v5e/v6e.
    n_split = 2 if (n == 1 and num_s >= 2 and num_s % 2 == 0) else 1
    s_per = num_s // n_split

    kernel = functools.partial(kernel_fn, hw=hw, inv_m=1.0 / float(mean_denom),
                               tm=tm, num_s=num_s, mask_tail=mask_tail)

    # Explicit VMEM budget: double-buffered x/target/weight/bias/out blocks +
    # f32 accumulator.  Only raise the scoped limit when it would not fit the
    # conservative 16 MiB (v5e) default; cap at v7x's 64 MiB physical.
    x_isz = x3.dtype.itemsize
    vmem_need = (2 * (c_in * tm * x_isz
                      + t_rows * tm * t3.dtype.itemsize
                      + c_out * c_in * x_isz
                      + c_out * 4
                      + 8 * 128 * 4)
                 + acc_shape[0] * tm * 4)
    vmem_limit = None
    if vmem_need > 12 * (1 << 20):
        vmem_limit = min(int(vmem_need * 2), 64 * (1 << 20))

    partials = pl.pallas_call(
        kernel,
        out_shape=jax.ShapeDtypeStruct((n, n_split, 8, 128), jnp.float32),
        grid_spec=pltpu.PrefetchScalarGridSpec(
            num_scalar_prefetch=0,
            grid=(n, n_split, s_per),                # (image, split, tile)
            in_specs=[
                pl.BlockSpec((None, c_in, tm),
                             lambda i, p, s: (i, 0, p * s_per + s)),   # x slab
                pl.BlockSpec((c_out, c_in), lambda i, p, s: (0, 0)),   # weight
                pl.BlockSpec((c_out, 1), lambda i, p, s: (0, 0)),      # bias
                pl.BlockSpec(t_blockdims,
                             lambda i, p, s: (i, 0, p * s_per + s)),   # targets
            ],
            out_specs=pl.BlockSpec((None, None, 8, 128),
                                   lambda i, p, s: (i, p, 0, 0)),
            scratch_shapes=[pltpu.VMEM(acc_shape, jnp.float32)],
        ),
        compiler_params=pltpu.CompilerParams(
            dimension_semantics=("parallel", "parallel", "arbitrary"),
            vmem_limit_bytes=vmem_limit),
    )(x3, wt, b, t3)

    # One scalar per (image, split) partition (broadcast over its (8,128)
    # tile); the tiny cross-partition sum is done in plain JAX.
    return jnp.sum(partials[:, :, 0, 0])


# -----------------------------------------------------------------------------
# Network wrapper (Pallas port of FuseRoad_factory.Network, synthetic heads)
# -----------------------------------------------------------------------------
class Network:
    def __init__(self, key, c_in, num_classes, lane_dim):
        k1, k2, k3, k4 = jax.random.split(key, 4)
        # heads stored transposed: (C_out, C_in) so the kernel's w_T @ x needs
        # no in-kernel transpose; biases stored as (C_out, 1) columns.
        self.w_seg_t = 0.1 * jax.random.normal(k1, (num_classes, c_in), jnp.float32)
        self.b_seg = 0.01 * jax.random.normal(k2, (num_classes, 1), jnp.float32)
        self.w_lane_t = 0.1 * jax.random.normal(k3, (lane_dim, c_in), jnp.float32)
        self.b_lane = 0.01 * jax.random.normal(k4, (lane_dim, 1), jnp.float32)
        self.num_classes = num_classes
        self.lane_dim = lane_dim

    def forward(self, model_mode, iteration, save, viz_split, xs, ys,
                tm=1024, **kwargs):
        x = xs[0]                                     # (N, C_in, H, W)
        n, _, h, w = x.shape

        # TODO(synk): save_seg_pred (cv2 / torchvision file-I/O visualization)
        # has no Pallas/TPU equivalent; intentionally skipped.

        if model_mode == "lane_shape":
            t = ys[0]                                 # (N, lane_dim, H, W) f32
            return _fused_head_loss("lane_shape", x, self.w_lane_t, self.b_lane,
                                    t, mean_denom=n * h * w * self.lane_dim,
                                    tm=tm)
        elif model_mode == "seg":
            t = ys[0]                                 # (N, H, W) int class ids
            return _fused_head_loss("seg", x, self.w_seg_t, self.b_seg, t,
                                    mean_denom=n * h * w, tm=tm)
        raise ValueError(f"unknown model_mode: {model_mode}")

    # pure-JAX f32 reference for a spot-check
    def _reference(self, model_mode, xs, ys):
        x = xs[0].astype(jnp.float32)
        c_in = x.shape[1]
        x_rows = jnp.transpose(x, (0, 2, 3, 1)).reshape(-1, c_in)
        if model_mode == "lane_shape":
            t_rows = jnp.transpose(ys[0].astype(jnp.float32),
                                   (0, 2, 3, 1)).reshape(-1, self.lane_dim)
            preds = x_rows @ self.w_lane_t.T + self.b_lane.reshape(1, -1)
            return jnp.mean((preds - t_rows) ** 2)
        cls = ys[0].reshape(-1).astype(jnp.int32)
        logits = x_rows @ self.w_seg_t.T + self.b_seg.reshape(1, -1)
        logsm = jax.nn.log_softmax(logits, axis=-1)
        ce = -jnp.take_along_axis(logsm, cls[:, None], axis=-1)
        return jnp.mean(ce)


# -----------------------------------------------------------------------------
if __name__ == "__main__":
    key = jax.random.PRNGKey(0)
    k_net, k_x, k_cls, k_lane, k_x1, k_cls1 = jax.random.split(key, 6)

    N, C_IN, H, W = 2, 4, 16, 16
    NUM_CLASSES, LANE_DIM = 8, 8

    net = Network(k_net, C_IN, NUM_CLASSES, LANE_DIM)

    # inputs (NCHW, matching the PyTorch convention), f32 — no wrapper casts
    x = jax.random.normal(k_x, (N, C_IN, H, W), jnp.float32)

    # 'seg' ground truth: per-pixel class-index map (N, H, W) int32
    seg_gt = jax.random.randint(k_cls, (N, H, W), 0, NUM_CLASSES, dtype=jnp.int32)

    # 'lane_shape' ground truth: dense regression targets (N, lane_dim, H, W)
    lane_gt = jax.random.normal(k_lane, (N, LANE_DIM, H, W), jnp.float32)

    seg_loss = net.forward("seg", iteration=1, save=False, viz_split="train",
                           xs=[x], ys=[seg_gt])
    lane_loss = net.forward("lane_shape", iteration=1, save=False,
                            viz_split="train", xs=[x], ys=[lane_gt])

    # batch=1 path with tm=128 -> 2 spatial splits (exercises the second
    # "parallel" grid axis used to keep v7x's second TensorCore busy).
    x1 = jax.random.normal(k_x1, (1, C_IN, H, W), jnp.float32)
    seg_gt1 = jax.random.randint(k_cls1, (1, H, W), 0, NUM_CLASSES,
                                 dtype=jnp.int32)
    seg_loss1 = net.forward("seg", iteration=1, save=False, viz_split="train",
                            xs=[x1], ys=[seg_gt1], tm=128)

    jax.block_until_ready((seg_loss, lane_loss, seg_loss1))

    ref_seg = net._reference("seg", [x], [seg_gt])
    ref_lane = net._reference("lane_shape", [x], [lane_gt])
    ref_seg1 = net._reference("seg", [x1], [seg_gt1])

    assert jnp.allclose(seg_loss, ref_seg, rtol=1e-4, atol=1e-5), (seg_loss, ref_seg)
    assert jnp.allclose(lane_loss, ref_lane, rtol=1e-4, atol=1e-5), (lane_loss, ref_lane)
    assert jnp.allclose(seg_loss1, ref_seg1, rtol=1e-4, atol=1e-5), (seg_loss1, ref_seg1)

    print("KERNEL_OK")
</pallas_src>

<mosaic_0001>
module attributes {stable_mosaic.version = 11 : i64} {
  func.func @_seg_ce_kernel(%arg0: i32, %arg1: i32, %arg2: i32, %arg3: memref<1x4x256xf32, #tpu.memory_space<vmem>>, %arg4: memref<8x4xf32, #tpu.memory_space<vmem>>, %arg5: memref<8x1xf32, #tpu.memory_space<vmem>>, %arg6: memref<1x1x256xi32, #tpu.memory_space<vmem>>, %arg7: memref<1x1x8x128xf32, #tpu.memory_space<vmem>>, %arg8: memref<1x256xf32, #tpu.memory_space<vmem>>) attributes {dimension_semantics = [#tpu.dimension_semantics<parallel>, #tpu.dimension_semantics<parallel>, #tpu.dimension_semantics<arbitrary>], iteration_bounds = array<i64: 2, 1, 1>, scalar_prefetch = 0 : i64, scratch_operands = 1 : i64, tpu.core_type = #tpu.core_type<tc>, window_params = [{transform_indices = @transform_0, window_bounds = array<i64: 1, 4, 256>}, {pipeline_mode = #tpu.pipeline_mode<synchronous>, transform_indices = @transform_1, window_bounds = array<i64: 8, 4>}, {pipeline_mode = #tpu.pipeline_mode<synchronous>, transform_indices = @transform_2, window_bounds = array<i64: 8, 1>}, {transform_indices = @transform_3, window_bounds = array<i64: 1, 1, 256>}, {transform_indices = @transform_4, window_bounds = array<i64: 1, 1, 8, 128>}]} {
    %c0_i32 = arith.constant 0 : i32
    %0 = arith.cmpi eq, %arg2, %c0_i32 : i32
    %1 = arith.extui %0 : i1 to i32
    %c0_i32_0 = arith.constant 0 : i32
    %2 = arith.cmpi ne, %1, %c0_i32_0 : i32
    scf.if %2 {
      %cst_20 = arith.constant 0.000000e+00 : f32
      %34 = vector.broadcast %cst_20 : f32 to vector<1x256xf32>
      %c0_21 = arith.constant 0 : index
      %c0_22 = arith.constant 0 : index
      %35 = vector.load %arg8[%c0_21, %c0_22] : memref<1x256xf32, #tpu.memory_space<vmem>>, vector<1x256xf32>
      tpu.vector_store %arg8[%c0_21, %c0_22], %34 {strides = array<i32>} : memref<1x256xf32, #tpu.memory_space<vmem>>, vector<1x256xf32>,
    } else {
    }
    %c0 = arith.constant 0 : index
    %c0_1 = arith.constant 0 : index
    %3 = vector.load %arg4[%c0, %c0_1] : memref<8x4xf32, #tpu.memory_space<vmem>>, vector<8x4xf32>
    %c0_2 = arith.constant 0 : index
    %c0_3 = arith.constant 0 : index
    %c0_4 = arith.constant 0 : index
    %4 = vector.load %arg3[%c0_2, %c0_3, %c0_4] : memref<1x4x256xf32, #tpu.memory_space<vmem>>, vector<1x4x256xf32>
    %5 = vector.shape_cast %4 : vector<1x4x256xf32> to vector<4x256xf32>
    %cst = arith.constant dense<0.000000e+00> : vector<8x256xf32>
    %6 = tpu.matmul %3, %5, %cst {dimension_numbers = #tpu.dot_dimension_numbers<[1], [0], [0], [1], [0, 0, 1, 1], [], []>} : vector<8x4xf32>, vector<4x256xf32>, vector<8x256xf32> -> vector<8x256xf32>
    %c0_5 = arith.constant 0 : index
    %c0_6 = arith.constant 0 : index
    %7 = vector.load %arg5[%c0_5, %c0_6] : memref<8x1xf32, #tpu.memory_space<vmem>>, vector<8x1xf32>
    %8 = vector.broadcast %7 : vector<8x1xf32> to vector<8x256xf32>
    %9 = arith.addf %6, %8 : vector<8x256xf32>
    %cst_7 = arith.constant dense<0xFF800000> : vector<256xf32>
    %10 = vector.multi_reduction <maximumf>, %9, %cst_7 [0] : vector<8x256xf32> to vector<256xf32>
    %11 = vector.shape_cast %10 : vector<256xf32> to vector<1x256xf32>
    %12 = vector.broadcast %11 : vector<1x256xf32> to vector<8x256xf32>
    %13 = arith.subf %9, %12 : vector<8x256xf32>
    %14 = math.exp %13 : vector<8x256xf32>
    %cst_8 = arith.constant dense<0.000000e+00> : vector<256xf32>
    %15 = vector.multi_reduction <add>, %14, %cst_8 [0] : vector<8x256xf32> to vector<256xf32>
    %16 = vector.shape_cast %15 : vector<256xf32> to vector<1x256xf32>
    %17 = math.log %16 : vector<1x256xf32>
    %c0_9 = arith.constant 0 : index
    %c0_10 = arith.constant 0 : index
    %c0_11 = arith.constant 0 : index
    %18 = vector.load %arg6[%c0_9, %c0_10, %c0_11] : memref<1x1x256xi32, #tpu.memory_space<vmem>>, vector<1x1x256xi32>
    %19 = vector.shape_cast %18 : vector<1x1x256xi32> to vector<1x256xi32>
    %20 = tpu.iota {dimensions = array<i32: 0>} : vector<8x256xi32>
    %21 = vector.broadcast %19 : vector<1x256xi32> to vector<8x256xi32>
    %22 = arith.cmpi eq, %20, %21 : vector<8x256xi32>
    %cst_12 = arith.constant 0.000000e+00 : f32
    %23 = vector.broadcast %cst_12 : f32 to vector<8x256xf32>
    %24 = arith.select %22, %13, %23 : vector<8x256xi1>, vector<8x256xf32>
    %cst_13 = arith.constant dense<0.000000e+00> : vector<256xf32>
    %25 = vector.multi_reduction <add>, %24, %cst_13 [0] : vector<8x256xf32> to vector<256xf32>
    %26 = vector.shape_cast %25 : vector<256xf32> to vector<1x256xf32>
    %27 = arith.subf %17, %26 : vector<1x256xf32>
    %c0_14 = arith.constant 0 : index
    %c0_15 = arith.constant 0 : index
    %28 = vector.load %arg8[%c0_14, %c0_15] : memref<1x256xf32, #tpu.memory_space<vmem>>, vector<1x256xf32>
    %29 = arith.addf %28, %27 : vector<1x256xf32>
    %c0_16 = arith.constant 0 : index
    %c0_17 = arith.constant 0 : index
    %30 = vector.load %arg8[%c0_16, %c0_17] : memref<1x256xf32, #tpu.memory_space<vmem>>, vector<1x256xf32>
    tpu.vector_store %arg8[%c0_16, %c0_17], %29 {strides = array<i32>} : memref<1x256xf32, #tpu.memory_space<vmem>>, vector<1x256xf32>,
    %c0_i32_18 = arith.constant 0 : i32
    %31 = arith.cmpi eq, %arg2, %c0_i32_18 : i32
    %32 = arith.extui %31 : i1 to i32
    %c0_i32_19 = arith.constant 0 : i32
    %33 = arith.cmpi ne, %32, %c0_i32_19 : i32
    scf.if %33 {
      %c0_20 = arith.constant 0 : index
      %c0_21 = arith.constant 0 : index
      %34 = vector.load %arg8[%c0_20, %c0_21] : memref<1x256xf32, #tpu.memory_space<vmem>>, vector<1x256xf32>
      %35 = vector.shape_cast %34 : vector<1x256xf32> to vector<1x1x256xf32>
      %cst_22 = arith.constant dense<0.000000e+00> : vector<1xf32>
      %36 = vector.multi_reduction <add>, %35, %cst_22 [1, 2] : vector<1x1x256xf32> to vector<1xf32>
      %37 = vector.shape_cast %36 : vector<1xf32> to vector<1x1x1xf32>
      %38 = vector.extract %37[0, 0, 0] : f32 from vector<1x1x1xf32>
      %cst_23 = arith.constant 0.001953125 : f32
      %39 = arith.mulf %38, %cst_23 : f32
      %40 = vector.broadcast %39 : f32 to vector<8x128xf32>
      %c0_24 = arith.constant 0 : index
      %c0_25 = arith.constant 0 : index
      %c0_26 = arith.constant 0 : index
      %c0_27 = arith.constant 0 : index
      %41 = vector.load %arg7[%c0_24, %c0_25, %c0_26, %c0_27] : memref<1x1x8x128xf32, #tpu.memory_space<vmem>>, vector<1x1x8x128xf32>
      %42 = vector.shape_cast %41 : vector<1x1x8x128xf32> to vector<8x128xf32>
      %43 = vector.shape_cast %40 : vector<8x128xf32> to vector<1x1x8x128xf32>
      tpu.vector_store %arg7[%c0_24, %c0_25, %c0_26, %c0_27], %43 {strides = array<i32>} : memref<1x1x8x128xf32, #tpu.memory_space<vmem>>, vector<1x1x8x128xf32>,
    } else {
    }
    return
  }
  func.func @transform_0(%arg0: i32, %arg1: i32, %arg2: i32) -> (i32, i32, i32) {
    %c1_i32 = arith.constant 1 : i32
    %0 = arith.muli %arg1, %c1_i32 : i32
    %1 = arith.addi %0, %arg2 : i32
    %c0_i32 = arith.constant 0 : i32
    %c0_i32_0 = arith.constant 0 : i32
    return %arg0, %c0_i32, %1 : i32, i32, i32
  }
  func.func @transform_1(%arg0: i32, %arg1: i32, %arg2: i32) -> (i32, i32) {
    %c0_i32 = arith.constant 0 : i32
    %c0_i32_0 = arith.constant 0 : i32
    %c0_i32_1 = arith.constant 0 : i32
    return %c0_i32, %c0_i32_0 : i32, i32
  }
  func.func @transform_2(%arg0: i32, %arg1: i32, %arg2: i32) -> (i32, i32) {
    %c0_i32 = arith.constant 0 : i32
    %c0_i32_0 = arith.constant 0 : i32
    %c0_i32_1 = arith.constant 0 : i32
    return %c0_i32, %c0_i32_0 : i32, i32
  }
  func.func @transform_3(%arg0: i32, %arg1: i32, %arg2: i32) -> (i32, i32, i32) {
    %c1_i32 = arith.constant 1 : i32
    %0 = arith.muli %arg1, %c1_i32 : i32
    %1 = arith.addi %0, %arg2 : i32
    %c0_i32 = arith.constant 0 : i32
    %c0_i32_0 = arith.constant 0 : i32
    return %arg0, %c0_i32, %1 : i32, i32, i32
  }
  func.func @transform_4(%arg0: i32, %arg1: i32, %arg2: i32) -> (i32, i32, i32, i32) {
    %c0_i32 = arith.constant 0 : i32
    %c0_i32_0 = arith.constant 0 : i32
    %c0_i32_1 = arith.constant 0 : i32
    return %arg0, %arg1, %c0_i32, %c0_i32_0 : i32, i32, i32, i32
  }
}

</mosaic_0001>

<bundles_post_ra>
// kernel: tpu_custom_call.1
= control target key start
LH: loop header
LB: loop body
LE: loop exit
PB: predicated region body
PF: predicated region fallthrough
CT: control target
= control target key end

     0   :  { %9 = vsyncpa [#allocation4], 0  ;;  %s940_s0 = inlined_call_operand.vmem [shape: f32[2,4,256], index: 0, kind: input, shape index: {}]   ;;  %s941_s1 = inlined_call_operand.vmem [shape: f32[8,4], index: 1, kind: input, shape index: {}]   ;;  %s942_s2 = inlined_call_operand.vmem [shape: f32[8,1], index: 2, kind: input, shape index: {}]   ;;  %s943_s3 = inlined_call_operand.vmem [shape: s32[2,1,256], index: 3, kind: input, shape index: {}]   ;;  %s944_s4 = inlined_call_operand.hbm [shape: f32[2,1,8,128], index: 4, kind: output, shape index: {}]  }
   0x1   :  { %11 = vsyncpa [#allocation4 + $0x1], 0  ;;  %s799_s15 = smov 0   ;;  %s801_s16 = smov 0  }
   0x2   :  { %s803_s17 = smov 0   ;;  %s805_s18 = smov 0  }
   0x3   :  { %s807_s19 = smov 0   ;;  %s809_s20 = smov 0  }
   0x4 LB: > { %s605_s21 = sadd.s32 4294967295, %s768_s20   ;;  %s606_s22 = sadd.s32 4294967294, %s768_s20   ;;  %s768_s20 = sphi %s809_s20, %s17_s20   ;;  %s764_s19 = sphi %s807_s19, %s953_s19   ;;  %s760_s18 = sphi %s805_s18, %s952_s18   ;;  %s756_s17 = sphi %s803_s17, %s951_s17   ;;  %s752_s16 = sphi %s801_s16, %s950_s16   ;;  %s748_s15 = sphi %s799_s15, %s949_s15  }
   0x5   : > { %s36_s23 = sadd.s32 1, %s764_s19  ;;  %s147_s24 = sadd.s32 1, %s756_s17 }
   0x6   : > { %p38_p0 = scmp.ge.s32.totalorder %s36_s23, 2  ;;  %p157_p1 = scmp.ne.s32.totalorder %s756_s17, %s752_s16 }
   0x7   : > { %p158_p2 = scmp.eq.s32.totalorder %s605_s21, 1  ;;  %p163_p3 = scmp.ne.s32.totalorder %s752_s16, %s748_s15 }
   0x8   : > { %s955_s23 = smov (%p38_p0, %s36_s23), 0  ;;  %p164_p5 = scmp.eq.s32.totalorder %s606_s22, 1 }
   0x9   : > { %p839_p4 = por %p158_p2, %p157_p1  ;;  %s142_s26 = ssub.s32 %s764_s19, %s955_s23 }
   0xa   : > { %p609_p6 = scmp.ge.s32.totalorder %s768_s20, 1  ;;  %p145_p7 = scmp.eq.s32.totalorder %s142_s26, 0 }
   0xb   : > { %p846_p8 = por %p164_p5, %p163_p3  ;;  %p217_p9 = scmp.lt.s32.totalorder %s768_s20, 3 }
   0xc   : > { %s852_s28 = scalar_select %p145_p7, %s756_s17, %s147_s24  }
   0xd   : > { %p218_p10 = pnand %p609_p6, %p217_p9 }
   0xe   : > { %p259_p11 = scmp.lt.s32.totalorder (!%p218_p10), %s760_s18, 1  ;;  %s254_s22 = sand.u32 (!%p218_p10), 1, %s752_s16  }
   0xf   : > { %221 = sbr.rel (%p218_p10) target bundleno = 523 (0x20b), region = 36  ;;  %s610_s24 = sshll.u32 (!%p218_p10), %s254_s22, 3 }
  0x10   : > { %s256_s26 = scalar_lea.vmem (!%p218_p10), [#allocation3], %s610_s24  ;;  %s618_s30 = sshll.u32 (!%p218_p10), %s760_s18, 7 }
  0x11   : > { %s513_s29 = sshll.u32 (!%p218_p10), %s256_s26, 4  ;;  %s499_s10 = scalar_lea.sflag (!%p218_p10), [#allocation4], %s254_s22  ;;  %s514_s29 = int_to_ptr.vmem [resolvable:$true] %s513_s29 }
  0x12   : > { %s692_s11 = scalar_lea.vmem (!%p218_p10), %s514_s29, 128 }
  0x13   : > { %p693_p12 = scmp.ne.s32.totalorder (!%p218_p10), %s514_s29, %s692_s11 }
  0x14   : > { %v284_v0 = vlaneseq  ;;  %v770_v1 = vmov 0.0   ;;  %v291_v2 = vld [vmem:[%s942_s2] sm:$0xff]  ;;  %s260_s5 = scalar_select %p259_p11, %s760_s18, 1  ;;  %v771_v4 = vmov 0   ;;  %vm303_vm1 = vcmask 1043456  }
  0x15   : > { %372 = vmatprep.mubr.f32.mxu0 %v770_v1  ;;  %682 = vset.pattern.permute.xlu0 %v771_v4  ;;  %v289_v7 = vld [vmem:[%s941_s1] sm:$0xff]  ;;  %vm299_vm2 = vcmask 31744   ;;  %v772_v59 = vmov 1966171168   ;;  %vm482_vm5 = vcmask 1040384   ;;  %p694_p13 = pnand %p693_p12, %p839_p4 }
  0x16   : > { %vm859_vm0 = vcmp.lt.s32.totalorder %v284_v0, 256  ;;  %294 = vperm.xlu0 %682, %v291_v2   ;;  %s621_s6 = sshll.u32 %s260_s5, 3  ;;  %s613_s12 = sshll.u32 %s260_s5, 1  ;;  %v874_v8 = vshrl.u32 %v284_v0, 7  ;;  %v447_v60 = vunpack.c.l.s4 %v772_v59 }
  0x17   : > { %288 = vst.msk [vmem:[#allocation2] sm:$0x3] %vm859_vm0, %v770_v1  ;;  %s266_s9 = scalar_lea.vmem %s940_s0, %s621_s6  ;;  %s277_s21 = scalar_lea.vmem %s943_s3, %s613_s12 }
  0x18   : > { %v290_v5 = vld [vmem:[%s266_s9] sm:$0xff]  ;;  %v418_v10 = vsub.s32 0, %v874_v8  ;;  %v422_v12 = vsub.s32 1, %v874_v8  ;;  %v448_v0 = vunpack.c.0.s8 %v447_v60  ;;  %s900_s9 = scalar_lea.hbm %s944_s4, %s618_s30  ;;  %p695_p0 = pneg %p694_p13 }
  0x19   : > { %v298_v6 = vcombine.high %v290_v5, %v290_v5  ;;  %v413_v9 = vld [vmem:[%s277_s21] sm:$0x3]  ;;  %s773_s12 = smov [#allocation3]  }
  0x1a   : > { %v419_v11 = vrot.slane %v413_v9, %v418_v10  ;;  %v423_v13 = vrot.slane %v413_v9, %v422_v12  ;;  %s696_s13 = sshll.u32 %s773_s12, 4  ;;  %s697_s13 = int_to_ptr.vmem [resolvable:$false] %s696_s13 }
  0x1b   : > { %614 = vmatprep.subr.msk.mxu0 %vm303_vm1, %v298_v6  ;;  %s698_s18 = scalar_lea.vmem %s697_s13, 256  ;;  %p699_p1 = scmp.lt.s32.totalorder %s514_s29, %s697_s13 }
  0x1c   : > { %615 = vmatpush1.msk.msra.mxu0 %vm303_vm1, %v290_v5  ;;  %vm424_vm3 = vcmp.eq.s32.totalorder %v874_v8, %v419_v11  ;;  %vm425_vm4 = vcmp.eq.s32.totalorder %v874_v8, %v423_v13  ;;  %p700_p2 = scmp.lt.s32.totalorder %s698_s18, %s692_s11 }
  0x1d   : > { %616 = vmatmul.mubr.msk.f32.vlgmr.msra.gmra.mxu0 %vm299_vm2, %v289_v7  ;;  %v451_v7 = vsub.s32 %v448_v0, %v874_v8 }
  0x1e   : > { %p701_p3 = por %p700_p2, %p699_p1 }
  0x20   : > { %p702_p5 = pnand %p701_p3, %p695_p0 }
  0x91   : > { %v295_v14 = vpop.permute.xlu0 %294 }
  0xdd   : > { %v374_v15 = vpop.f32.mrf.mxu0 }
  0xde   : > { %v375_v16 = vadd.f32 %v374_v15, %v295_v14  ;;  %v442_v15 = vld [vmem:[#allocation2] sm:$0x3] }
  0xdf   : > { %v376_v17 = vpop.f32.mrf.mxu0 }
  0xe0   : > { %v379_v18 = vrot.slane %v375_v16, 4  ;;  %v377_v19 = vadd.f32 %v376_v17, %v295_v14 }
  0xe2   : > { %v380_v20 = vmax.f32 %v375_v16, %v379_v18  ;;  %v385_v21 = vrot.slane %v377_v19, 4 }
  0xe4   : > { %v381_v22 = vrot.slane %v380_v20, 2  ;;  %v386_v23 = vmax.f32 %v377_v19, %v385_v21 }
  0xe6   : > { %v382_v24 = vmax.f32 %v380_v20, %v381_v22  ;;  %v387_v25 = vrot.slane %v386_v23, 2 }
  0xe8   : > { %v383_v26 = vrot.slane %v382_v24, 1  ;;  %v388_v27 = vmax.f32 %v386_v23, %v387_v25 }
  0xea   : > { %v384_v28 = vmax.f32 %v382_v24, %v383_v26  ;;  %v389_v29 = vrot.slane %v388_v27, 1 }
  0xec   : > { %v391_v30 = vsub.f32 %v375_v16, %v384_v28  ;;  %v390_v31 = vmax.f32 %v388_v27, %v389_v29 }
  0xee   : > { %v393_v32 = vmul.f32 1.442695, %v391_v30  ;;  %v392_v33 = vsub.f32 %v377_v19, %v390_v31  ;;  %v426_v42 = vsel %vm424_vm3, %v391_v30, 0.0 }
  0xef   : > { %v428_v48 = vrot.slane %v426_v42, 4 }
  0xf0   : > { %684 = vpow2.f32 %v393_v32  ;;  %v395_v34 = vmul.f32 1.442695, %v392_v33  ;;  %v427_v43 = vsel %vm425_vm4, %v392_v33, 0.0 }
  0xf1   : > { %v434_v49 = vrot.slane %v427_v43, 4  ;;  %v429_v53 = vadd.f32 %v428_v48, %v426_v42 }
  0xf2   : > { %686 = vpow2.f32 %v395_v34 }
  0xf3   : > { %v435_v54 = vadd.f32 %v434_v49, %v427_v43  ;;  %v430_v55 = vrot.slane %v429_v53, 2 }
  0xf5   : > { %v436_v56 = vrot.slane %v435_v54, 2  ;;  %v431_v57 = vadd.f32 %v430_v55, %v429_v53 }
  0xf7   : > { %v437_v58 = vadd.f32 %v436_v56, %v435_v54  ;;  %v432_v61 = vrot.slane %v431_v57, 1 }
  0xf9   : > { %v438_v62 = vrot.slane %v437_v58, 1  ;;  %v433_v5 = vadd.f32 %v432_v61, %v431_v57 }
  0xfb   : > { %v439_v6 = vadd.f32 %v438_v62, %v437_v58 }
  0xfd   : > { %v685_v35 = vpop.eup %684 }
  0xfe   : > { %v397_v36 = vrot.slane %v685_v35, 4 }
  0xff   : > { %v687_v37 = vpop.eup %686 }
 0x100   : > { %v398_v38 = vadd.f32 %v685_v35, %v397_v36  ;;  %v403_v39 = vrot.slane %v687_v37, 4 }
 0x102   : > { %v399_v40 = vrot.slane %v398_v38, 2  ;;  %v404_v41 = vadd.f32 %v687_v37, %v403_v39 }
 0x104   : > { %v400_v44 = vadd.f32 %v399_v40, %v398_v38  ;;  %v405_v45 = vrot.slane %v404_v41, 2 }
 0x106   : > { %v401_v46 = vrot.slane %v400_v44, 1  ;;  %v406_v47 = vadd.f32 %v405_v45, %v404_v41 }
 0x108   : > { %v407_v50 = vrot.slane %v406_v47, 1  ;;  %v402_v51 = vadd.f32 %v401_v46, %v400_v44 }
 0x10a   : > { %v408_v52 = vadd.f32 %v407_v50, %v406_v47  ;;  %688 = vlog2.f32 %v402_v51 }
 0x10c   : > { %690 = vlog2.f32 %v408_v52 }
 0x117   : > { %v689_v63 = vpop.eup %688 }
 0x118   : > { %v410_v1 = vmul.f32 0.6931472, %v689_v63 }
 0x119   : > { %v691_v2 = vpop.eup %690 }
 0x11a   : > { %v412_v4 = vmul.f32 0.6931472, %v691_v2  ;;  %v440_v9 = vsub.f32 %v410_v1, %v433_v5 }
 0x11c   : > { %v441_v11 = vsub.f32 %v412_v4, %v439_v6 }
 0x11e   : > { %v445_v13 = vcombine.low %v440_v9, %v441_v11 }
 0x120   : > { %v452_v14 = vrot.slane %v445_v13, %v451_v7 }
 0x122   : > { %v459_v16 = vrot.slane %v452_v14, %v451_v7 }
 0x124   : > { %v461_v17 = vadd.f32 %v459_v16, %v442_v15 }
 0x126   : > { %466 = vst.msk [vmem:[#allocation2] sm:$0x3] %vm859_vm0, %v461_v17 }
 0x12d   : > { %v470_v18 = vld [vmem:[#allocation2] sm:$0x3] }
 0x12e   : > { %v475_v19 = vrot.slane %v470_v18, %v418_v10  ;;  %v479_v20 = vrot.slane %v470_v18, %v422_v12 }
 0x130   : > { %v483_v21 = vsel %vm482_vm5, %v475_v19, 0.0  ;;  %v484_v22 = vsel %vm482_vm5, %v479_v20, 0.0 }
 0x131   : > { %v485_v23 = vadd.f32 %v484_v22, %v483_v21 }
 0x133   : > { %486 = vadd.xlane.f32.xlu0 %v485_v23 }
 0x1bc   : > { %v487_v24 = vpop.xlane.xlu0 %486 }
 0x1bd   : > { %v488_v25 = vrot.slane %v487_v24, 4 }
 0x1bf   : > { %v489_v26 = vadd.f32 %v488_v25, %v487_v24 }
 0x1c1   : > { %v490_v27 = vrot.slane %v489_v26, 2 }
 0x1c3   : > { %v491_v3 = vadd.f32 %v490_v27, %v489_v26 }
 0x1c5   : > { %v492_v28 = vrot.slane %v491_v3, 1 }
 0x1c7   : > { %v493_v29 = vadd.f32 %v492_v28, %v491_v3 }
 0x1c9   : > { %622 = vpush %v493_v29 }
 0x1fa   : > { %s623_s5 = spop %622 }
 0x1fb   : > { %s495_s6 = smul.f32 0.001953125, %s623_s5 }
 0x1fd   : > { %v496_v8 = vstv %s495_s6 }
 0x1fe   : > { %497 = vst [vmem:[%s256_s26] sm:$0xff] %v496_v8 }
 0x1ff   : > { %705 = shalt.err (!%p702_p5)
}
 0x200   : > { %s706_s14 = scalar_lea.hbm %s900_s9, 128  ;;  %s710_s24 = scalar_lea.hbm %s944_s4, 256 }
 0x201   : > { %p707_p6 = scmp.ne.s32.totalorder %s900_s9, %s706_s14  ;;  %p711_p10 = scmp.lt.s32.totalorder %s900_s9, %s944_s4 }
 0x202   : > { %p712_p11 = scmp.lt.s32.totalorder %s710_s24, %s706_s14 }
 0x203   : > { %p708_p7 = pnand %p707_p6, %p839_p4 }
 0x204   : > { %p713_p12 = por %p712_p11, %p711_p10 }
 0x205   : > { %p709_p9 = pneg %p708_p7 }
 0x207   : > { %p714_p13 = pnand %p713_p12, %p709_p9 }
 0x209   : > { %717 = shalt.err (!%p714_p13)
}
 0x20a   : > { %624 = dma.vmem_to_hbm [thread:$0]  (%p839_p4), %s514_s29, 128, %s900_s9, %s499_s10  }
 0x20b PF: > { %p630_p0 = scmp.ge.s32.totalorder %s768_s20, 2  ;;  %s525_s5 = sand.u32 1, %s748_s15  }
 0x20c   : > { %s526_s6 = scalar_lea.sflag [#allocation4], %s525_s5 }
 0x20d   : > { %p627_p1 = pnand %p630_p0, %p846_p8 }
 0x20f   : > { %p628_p2 = pneg %p627_p1 }
 0x211   : > { %743 = dma.done.wait (%p628_p2), %s526_s6, 128  }
 0x212   : > { %745 = vsyncadd (%p628_p2), %s526_s6, 4294967168  ;;  %s17_s20 = sadd.s32 1, %s768_s20   ;;  %s949_s15 = smov %s752_s16 }
 0x213   : > { %p14_p3 = scmp.ge.s32.totalorder %s17_s20, 4   ;;  %s950_s16 = smov %s756_s17 }
 0x214   : > { %s951_s17 = smov %s852_s28  ;;  %s952_s18 = smov %s764_s19 }
 0x215   : > { %s953_s19 = smov %s955_s23  ;;  %16 = sbr.rel (!%p14_p3) target bundleno = 4 (0x4), region = 82 }
 0x21a   :  { %531 = vsyncpa [#allocation4], 1 }
 0x21b   :  { %533 = vsyncpa [#allocation4 + $0x1], 1 }

</bundles_post_ra>
